<compile_context>
chip_gen: v5e
topology: v5e:2x2
jax: 0.10.0
libtpu: 0.0.40
codegen_flags: <defaults>
</compile_context>

<pallas_src>
import functools

import jax
import jax.numpy as jnp
from jax import lax
from jax.experimental import pallas as pl
from jax.experimental.pallas import tpu as pltpu


# ---------------------------------------------------------------- pass 1 ----
def _negsum_kernel(n_ref, s_ref):
    # Per batch-row sum over the negatives (f32 exp + cross-lane reduce).
    n = n_ref[...].astype(jnp.float32)                       # [TB, K]
    s_ref[...] = jnp.sum(jnp.exp(n), axis=1, keepdims=True)  # [TB, 1]


# ---------------------------------------------------------------- pass 2 ----
def _loss_kernel(pT_ref, s_ref, out_ref, acc_ref, *, batch, block, eps,
                 mask_tail):
    i = pl.program_id(0)

    @pl.when(i == 0)
    def _init():
        acc_ref[...] = jnp.zeros_like(acc_ref)

    pT = pT_ref[...].astype(jnp.float32)            # [P, TB]  batch on lanes
    s = s_ref[...]                                  # [1, TB]  batch on lanes

    # exp(p)/(exp(p)+S) == 1/(1 + S*exp(-p))  -- overflow-free, same eps math.
    ratio = 1.0 / (1.0 + s * jnp.exp(-pT))          # [P, TB]
    prob = -jnp.log(ratio + eps)                    # [P, TB]

    if mask_tail:
        # Only the tail block has columns past the real batch; they hold
        # unspecified data and are zeroed here (select, NaN-safe).
        col = i * block + lax.broadcasted_iota(jnp.int32, prob.shape, 1)
        prob = jnp.where(col < batch, prob, 0.0)

    # Lane-vector accumulator: one sublane reduce per step, no cross-lane work.
    acc_ref[...] += jnp.sum(prob, axis=0, keepdims=True)     # [1, TB]

    @pl.when(i == pl.num_programs(0) - 1)
    def _finalize():
        out_ref[...] = jnp.sum(acc_ref[...], keepdims=True)  # [1, 1]


# --------------------------------------------------------------- wrapper ----
def _pick_block(total, bytes_per_col, cap=16384, requested=None):
    """Batch-tile width: multiple of 128 (or the full extent), sized for
    ~24 MiB of double-buffered tiles and re-balanced so the tail block is
    nearly full (no next_power_of_2 padding blow-up)."""
    if requested is None:
        blk = ((12 << 20) // max(bytes_per_col, 1)) // 128 * 128
        blk = max(128, min(cap, blk))
    else:
        blk = max(128, (int(requested) // 128) * 128)
    if blk >= total:
        return int(total), 1
    nb = pl.cdiv(total, blk)
    blk = min(blk, pl.cdiv(pl.cdiv(total, nb), 128) * 128)
    nb = pl.cdiv(total, blk)
    return int(blk), int(nb)


def _vmem_limit(working_bytes):
    # Above v5e's 16 MiB default, below v7x's 64 MiB physical VMEM.
    return int(min(max(working_bytes + (8 << 20), 32 << 20), 48 << 20))


def loss_pallas(p, n, reg=0.0, eps=1e-6, block_b=None):
    """p: [B, P], n: [B, K]. Returns a scalar f32 loss (same math as torch Loss)."""
    assert p.ndim == 2 and n.ndim == 2 and p.shape[0] == n.shape[0]
    B, P = p.shape
    _, K = n.shape
    p_item = jnp.dtype(p.dtype).itemsize
    n_item = jnp.dtype(n.dtype).itemsize

    # ---- Pass 1: S[b] = sum_k exp(n[b, k]); n streamed once in its natural
    # [B, K] HBM layout (no transpose / pad pass over the bulk data).
    blk_a, nb_a = _pick_block(B, K * n_item + 4, requested=block_b)
    s_col = pl.pallas_call(
        _negsum_kernel,
        out_shape=jax.ShapeDtypeStruct((B, 1), jnp.float32),
        grid=(nb_a,),
        in_specs=[pl.BlockSpec((blk_a, K), lambda i: (i, 0))],
        out_specs=pl.BlockSpec((blk_a, 1), lambda i: (i, 0)),
        compiler_params=pltpu.CompilerParams(
            dimension_semantics=("parallel",),
            vmem_limit_bytes=_vmem_limit(2 * blk_a * (K * n_item + 4))),
    )(n)

    # ---- Pass 2: lane-dense  sum_{b,j} -log(1/(1 + S[b]*exp(-p[b,j])) + eps).
    # [B,1] -> [1,B] is a free row-major reshape (same for p when P == 1);
    # for small P > 1 the p transpose touches only P/(P+K) of the bytes.
    s_lane = jnp.reshape(s_col, (1, B))
    pT = jnp.reshape(p, (1, B)) if P == 1 else jnp.transpose(p)      # [P, B]

    blk_b, nb_b = _pick_block(B, P * p_item + 4, cap=32768, requested=block_b)
    mask_tail = (blk_b * nb_b != B)
    kernel = functools.partial(_loss_kernel, batch=B, block=blk_b,
                               eps=float(eps), mask_tail=mask_tail)
    out = pl.pallas_call(
        kernel,
        out_shape=jax.ShapeDtypeStruct((1, 1), jnp.float32),
        grid=(nb_b,),
        in_specs=[pl.BlockSpec((P, blk_b), lambda i: (0, i)),
                  pl.BlockSpec((1, blk_b), lambda i: (0, i))],
        out_specs=pl.BlockSpec((1, 1), lambda i: (0, 0)),
        scratch_shapes=[pltpu.VMEM((1, blk_b), jnp.float32)],
        compiler_params=pltpu.CompilerParams(
            dimension_semantics=("arbitrary",),
            vmem_limit_bytes=_vmem_limit(2 * blk_b * (P * p_item + 8))),
    )(pT, s_lane)

    return out[0, 0] + jnp.float32(reg)


def _reference(p, n, reg, eps):
    pe, ne = jnp.exp(p), jnp.exp(n)
    return jnp.sum(-jnp.log(pe / (pe + jnp.sum(ne, axis=1, keepdims=True)) + eps)) + reg


if __name__ == "__main__":
    key = jax.random.PRNGKey(0)
    kp, kn, kp2, kn2 = jax.random.split(key, 4)
    eps = 1e-6

    # Small shapes matching the module's forward (batch, positives, negatives).
    B, P, K = 8, 1, 32
    p = jax.random.normal(kp, (B, P), dtype=jnp.float32)
    n = jax.random.normal(kn, (B, K), dtype=jnp.float32)
    loss = loss_pallas(p, n, reg=0.0, eps=eps)
    jax.block_until_ready(loss)
    ref = _reference(p, n, 0.0, eps)
    assert jnp.allclose(loss, ref, rtol=1e-5, atol=1e-5), (loss, ref)

    # Non-multiple batch with an explicit small block: exercises multi-block
    # tiling, the masked tail block, the accumulator path and P > 1.
    B2, P2, K2 = 300, 2, 64
    p2 = jax.random.normal(kp2, (B2, P2), dtype=jnp.float32)
    n2 = jax.random.normal(kn2, (B2, K2), dtype=jnp.float32)
    loss2 = loss_pallas(p2, n2, reg=0.5, eps=eps, block_b=128)
    jax.block_until_ready(loss2)
    ref2 = _reference(p2, n2, 0.5, eps)
    assert jnp.allclose(loss2, ref2, rtol=1e-5, atol=1e-4), (loss2, ref2)

    print("KERNEL_OK")
</pallas_src>

<mosaic_0001>
module attributes {stable_mosaic.version = 11 : i64} {
  func.func @_negsum_kernel(%arg0: i32, %arg1: memref<8x32xf32, #tpu.memory_space<vmem>>, %arg2: memref<8x1xf32, #tpu.memory_space<vmem>>) attributes {dimension_semantics = [#tpu.dimension_semantics<parallel>], iteration_bounds = array<i64: 1>, scalar_prefetch = 0 : i64, scratch_operands = 0 : i64, tpu.core_type = #tpu.core_type<tc>, window_params = [{transform_indices = @transform_0, window_bounds = array<i64: 8, 32>}, {transform_indices = @transform_1, window_bounds = array<i64: 8, 1>}]} {
    %c0 = arith.constant 0 : index
    %c0_0 = arith.constant 0 : index
    %0 = vector.load %arg1[%c0, %c0_0] : memref<8x32xf32, #tpu.memory_space<vmem>>, vector<8x32xf32>
    %1 = math.exp %0 : vector<8x32xf32>
    %cst = arith.constant dense<0.000000e+00> : vector<8xf32>
    %2 = vector.multi_reduction <add>, %1, %cst [1] : vector<8x32xf32> to vector<8xf32>
    %3 = vector.shape_cast %2 : vector<8xf32> to vector<8x1xf32>
    %c0_1 = arith.constant 0 : index
    %c0_2 = arith.constant 0 : index
    %4 = vector.load %arg2[%c0_1, %c0_2] : memref<8x1xf32, #tpu.memory_space<vmem>>, vector<8x1xf32>
    tpu.vector_store %arg2[%c0_1, %c0_2], %3 {strides = array<i32>} : memref<8x1xf32, #tpu.memory_space<vmem>>, vector<8x1xf32>,
    return
  }
  func.func @transform_0(%arg0: i32) -> (i32, i32) {
    %c0_i32 = arith.constant 0 : i32
    %c0_i32_0 = arith.constant 0 : i32
    return %arg0, %c0_i32 : i32, i32
  }
  func.func @transform_1(%arg0: i32) -> (i32, i32) {
    %c0_i32 = arith.constant 0 : i32
    %c0_i32_0 = arith.constant 0 : i32
    return %arg0, %c0_i32 : i32, i32
  }
}

</mosaic_0001>

<bundles_post_ra>
// kernel: tpu_custom_call.1
= control target key start
LH: loop header
LB: loop body
LE: loop exit
PB: predicated region body
PF: predicated region fallthrough
CT: control target
= control target key end

     0   :  { %6 = vsyncpa [#allocation3], 0  ;;  %s65_s9 = smov [#allocation2]   ;;  %s82_s0 = inlined_call_operand.hbm [shape: f32[8,32], index: 0, kind: input, shape index: {}]   ;;  %s83_s1 = inlined_call_operand.vmem [shape: f32[8,1], index: 1, kind: output, shape index: {}]  }
   0x1   :  { %s12_s8 = sshll.u32 %s82_s0, 4  ;;  %s14_s10 = sshll.u32 %s65_s9, 4  ;;  %s13_s8 = int_to_ptr.hbm [resolvable:$true] %s12_s8  ;;  %s15_s10 = int_to_ptr.vmem [resolvable:$true] %s14_s10 }
   0x2   :  { %17 = dma.hbm_to_vmem [thread:$0]  %s13_s8, 128, %s15_s10, [#allocation3]  }
   0x3   :  { %63 = dma.done.wait [#allocation3], 128  }
   0x4   :  { %64 = vsyncadd [#allocation3], 4294967168  ;;  %v22_v0 = vld [vmem:[#allocation2] sm:$0xff]  ;;  %vm25_vm0 = vcmask 261120   ;;  %vm29_vm1 = vcmask 7168  }
   0x5   :  { %v23_v1 = vmul.f32 1.442695, %v22_v0 }
   0x7   :  { %37 = vpow2.f32 %v23_v1 }
   0xd   :  { %v38_v2 = vpop.eup %37 }
   0xe   :  { %v26_v3 = vsel %vm25_vm0, %v38_v2, 0.0 }
   0xf   :  { %27 = vadd.xlane.f32.xlu0 %v26_v3 }
  0x82   :  { %v28_v4 = vpop.xlane.xlu0 %27 }
  0x83   :  { %30 = vst.msk [vmem:[%s83_s1] sm:$0xff] %vm29_vm1, %v28_v4 }
  0x84   :  { %35 = vsyncpa [#allocation3], 1 }

</bundles_post_ra>
